<compile_context>
chip_gen: v7x
topology: tpu7x:2x2x1
jax: 0.10.0
libtpu: 0.0.40
codegen_flags: <defaults>
</compile_context>

<pallas_src>
import numpy as np
import jax
import jax.numpy as jnp
from jax.experimental import pallas as pl
from jax.experimental.pallas import tpu as pltpu


# ----------------------------------------------------------------------------
# Sinusoid table (identical to the PyTorch buffer, built on host).
# ----------------------------------------------------------------------------
def make_sinusoid_table(n_position: int, d_hid: int) -> jnp.ndarray:
    hid = np.arange(d_hid)
    inv_freq = np.power(10000.0, 2.0 * (hid // 2) / d_hid)   # 10000 ** (2*(k//2)/d)
    table = np.arange(n_position)[:, None] / inv_freq[None, :]
    table[:, 0::2] = np.sin(table[:, 0::2])
    table[:, 1::2] = np.cos(table[:, 1::2])
    return jnp.asarray(table, dtype=jnp.float32)              # (n_position, d_hid)


# ----------------------------------------------------------------------------
# Kernel body: plain broadcasting add on the VPU (shape/rank agnostic).
# Mixed dtypes (e.g. bf16 x + f32 pos) promote in-kernel, matching PyTorch.
# ----------------------------------------------------------------------------
def _pos_enc_kernel(x_ref, pos_ref, o_ref):
    o_ref[...] = (x_ref[...] + pos_ref[...]).astype(o_ref.dtype)


def _sublane_multiple(dtype) -> int:
    # Packed sublane tile: (8,128) f32, (16,128) bf16/f16, (32,128) int8/fp8.
    return {4: 8, 2: 16, 1: 32}.get(np.dtype(dtype).itemsize, 8)


def _round_down(x: int, m: int) -> int:
    return (x // m) * m


def _choose_fold(S: int, D: int):
    """Smallest f | S with (f*D) % 128 == 0; else smallest f | S with f*D >= 128."""
    divisors = [f for f in range(1, S + 1) if S % f == 0]
    for f in divisors:
        if (f * D) % 128 == 0:
            return f
    for f in divisors:
        if f * D >= 128:
            return f
    return None


# ----------------------------------------------------------------------------
# Layout A: batch-flattened (B, S*D); best when B >= sublane multiple or the
# per-batch slab is tiny.  pos is a (1, S*D) row broadcast over the batch.
# ----------------------------------------------------------------------------
def _call_batch_flat(x, pos, out_dtype, row_mult, target_bytes, vmem_limit, cost):
    B, S, D = x.shape
    N = S * D
    esize = max(np.dtype(x.dtype).itemsize, np.dtype(out_dtype).itemsize)

    x2 = x.reshape(B, N)
    pos2 = pos.reshape(1, N)

    # Row (batch) tile: full extent when small, else multiple of the packed tile.
    tb = B if B <= row_mult else row_mult
    max_cols = max(128, target_bytes // (tb * esize))
    tn = N if N <= max_cols else max(128, _round_down(max_cols, 128))
    if B > row_mult and tn == N:
        max_rows = max(row_mult, target_bytes // max(N * esize, 1))
        tb = B if max_rows >= B else max(row_mult, _round_down(max_rows, row_mult))

    # v7x megacore: guarantee >= 2 grid steps when the problem is big enough.
    if pl.cdiv(N, tn) * pl.cdiv(B, tb) == 1 and B * N * esize >= (1 << 20):
        if N >= 256:
            tn = max(128, _round_down(N // 2, 128))
        elif B >= 2 * row_mult:
            tb = max(row_mult, _round_down(B // 2, row_mult))

    n_col, n_row = pl.cdiv(N, tn), pl.cdiv(B, tb)

    out2 = pl.pallas_call(
        _pos_enc_kernel,
        out_shape=jax.ShapeDtypeStruct((B, N), out_dtype),
        # Batch innermost: pos block index depends only on the column tile, so
        # it is fetched once per column tile, not once per grid step.
        grid=(n_col, n_row),
        in_specs=[
            pl.BlockSpec((tb, tn), lambda j, i: (i, j)),   # x
            pl.BlockSpec((1, tn), lambda j, i: (0, j)),    # pos (broadcast over batch)
        ],
        out_specs=pl.BlockSpec((tb, tn), lambda j, i: (i, j)),
        compiler_params=pltpu.CompilerParams(
            dimension_semantics=("parallel", "parallel"),
            vmem_limit_bytes=vmem_limit,
        ),
        cost_estimate=cost,
    )(x2, pos2)
    return out2.reshape(B, S, D)


# ----------------------------------------------------------------------------
# Layout B: small-batch path.  x -> (B, S1, S2*D), pos -> (1, S1, S2*D), batch
# is its own (innermost) grid axis, positions fill the sublane axis.
# ----------------------------------------------------------------------------
def _call_batch_grid(x, pos, out_dtype, row_mult, target_bytes, vmem_limit, cost, fold):
    B, S, D = x.shape
    S1 = S // fold
    C = fold * D
    esize = max(np.dtype(x.dtype).itemsize, np.dtype(out_dtype).itemsize)

    x3 = x.reshape(B, S1, C)
    pos3 = pos.reshape(1, S1, C)

    # Column tile: multiple of 128 (or full extent); row tile: multiple of the
    # packed sublane tile (or full extent), both sized to ~target_bytes.
    if C * row_mult * esize <= target_bytes:
        tc = C
    else:
        tc = max(128, _round_down(target_bytes // (row_mult * esize), 128))
    max_rows = max(row_mult, target_bytes // max(tc * esize, 1))
    tr = S1 if S1 <= max_rows else max(row_mult, _round_down(max_rows, row_mult))

    # v7x megacore: guarantee >= 2 grid steps when the problem is big enough.
    if B * pl.cdiv(S1, tr) * pl.cdiv(C, tc) == 1 and S1 * C * esize >= (1 << 20):
        if C >= 256:
            tc = max(128, _round_down(C // 2, 128))
        elif S1 >= 2 * row_mult:
            tr = max(row_mult, _round_down(S1 // 2, row_mult))

    n_p, n_col = pl.cdiv(S1, tr), pl.cdiv(C, tc)

    out3 = pl.pallas_call(
        _pos_enc_kernel,
        out_shape=jax.ShapeDtypeStruct((B, S1, C), out_dtype),
        # Batch innermost: the pos block index (0, p, j) is constant across it,
        # so pos HBM traffic stays at its natural size (S*D) even though the
        # same pos block is reused by every batch element.
        grid=(n_p, n_col, B),
        in_specs=[
            pl.BlockSpec((1, tr, tc), lambda p, j, b: (b, p, j)),   # x
            pl.BlockSpec((1, tr, tc), lambda p, j, b: (0, p, j)),   # pos
        ],
        out_specs=pl.BlockSpec((1, tr, tc), lambda p, j, b: (b, p, j)),
        compiler_params=pltpu.CompilerParams(
            dimension_semantics=("parallel", "parallel", "parallel"),
            vmem_limit_bytes=vmem_limit,
        ),
        cost_estimate=cost,
    )(x3, pos3)
    return out3.reshape(B, S, D)


# ----------------------------------------------------------------------------
# Public wrapper.
# ----------------------------------------------------------------------------
def positional_encoding(x: jnp.ndarray, pos_table: jnp.ndarray, out_dtype=None) -> jnp.ndarray:
    """x: (B, S, D), pos_table: (n_position, D). Returns x + pos_table[:S].

    out_dtype=None (default) matches PyTorch promotion (x + fp32 buffer);
    pass out_dtype=x.dtype for the bandwidth-optimal narrow-output variant.
    """
    B, S, D = x.shape
    assert pos_table.shape[1] == D and pos_table.shape[0] >= S, "S must be <= n_position"

    if out_dtype is None:
        out_dtype = jnp.promote_types(x.dtype, pos_table.dtype)
    pos = pos_table[:S, :].astype(out_dtype)

    row_mult = _sublane_multiple(x.dtype)         # dtype-aware packed sublane tile
    x_esize = np.dtype(x.dtype).itemsize
    out_esize = np.dtype(out_dtype).itemsize
    pos_esize = np.dtype(pos.dtype).itemsize

    target_bytes = 2 << 20      # ~2 MiB tiles: ~85% of HBM roofline, safe on v7x's 64 MiB VMEM
    vmem_limit = 32 << 20       # > v5e's 16 MiB default, well under v7x's 64 MiB/TC
    # Live VMEM @ 2 MiB tiles: 2x(x) + 2x(out) + 2x(sublane-padded pos) << 32 MiB.

    cost = pl.CostEstimate(     # memory-bound hint for the XLA scheduler
        flops=B * S * D,
        transcendentals=0,
        bytes_accessed=B * S * D * (x_esize + out_esize) + S * D * pos_esize,
    )

    # Small-batch path: a (B, S*D) layout would leave most sublanes of every
    # block invalid; pack positions onto the sublane axis instead, provided the
    # fold keeps a lane-dense column axis and the per-batch slab is non-trivial.
    if B < row_mult:
        fold = _choose_fold(S, D)
        if (fold is not None
                and (S // fold) >= row_mult
                and S * D * x_esize >= (128 << 10)):
            return _call_batch_grid(x, pos, out_dtype, row_mult,
                                    target_bytes, vmem_limit, cost, fold)

    return _call_batch_flat(x, pos, out_dtype, row_mult,
                            target_bytes, vmem_limit, cost)


if __name__ == "__main__":
    key = jax.random.PRNGKey(0)

    # --- Test 1: module-sized fp32 case (batch=2, seq=8, d_hid=32) -----------
    B, S, D = 2, 8, 32
    n_position = 200
    pos_table = make_sinusoid_table(n_position, D)

    k1, k2 = jax.random.split(key)
    x = jax.random.normal(k1, (B, S, D), dtype=jnp.float32)
    out = jax.block_until_ready(positional_encoding(x, pos_table))
    ref = x + pos_table[None, :S, :]
    np.testing.assert_allclose(np.asarray(out), np.asarray(ref), rtol=1e-6, atol=1e-6)

    # --- Test 2: small-batch bf16 case exercising the sublane-packed path ----
    B2, S2, D2 = 2, 512, 128
    pos_table2 = make_sinusoid_table(1024, D2)
    x2 = jax.random.normal(k2, (B2, S2, D2), dtype=jnp.bfloat16)
    out2 = jax.block_until_ready(positional_encoding(x2, pos_table2))
    ref2 = x2 + pos_table2[None, :S2, :]          # promotes to f32, like PyTorch
    np.testing.assert_allclose(np.asarray(out2), np.asarray(ref2), rtol=1e-5, atol=1e-5)

    print("KERNEL_OK")
</pallas_src>

<mosaic_0001>
module attributes {stable_mosaic.version = 11 : i64} {
  func.func @_pos_enc_kernel(%arg0: i32, %arg1: i32, %arg2: memref<2x256xf32, #tpu.memory_space<vmem>>, %arg3: memref<1x256xf32, #tpu.memory_space<vmem>>, %arg4: memref<2x256xf32, #tpu.memory_space<vmem>>) attributes {dimension_semantics = [#tpu.dimension_semantics<parallel>, #tpu.dimension_semantics<parallel>], iteration_bounds = array<i64: 1, 1>, scalar_prefetch = 0 : i64, scratch_operands = 0 : i64, tpu.core_type = #tpu.core_type<tc>, window_params = [{transform_indices = @transform_0, window_bounds = array<i64: 2, 256>}, {transform_indices = @transform_1, window_bounds = array<i64: 1, 256>}, {transform_indices = @transform_2, window_bounds = array<i64: 2, 256>}]} {
    %c0 = arith.constant 0 : index
    %c0_0 = arith.constant 0 : index
    %0 = vector.load %arg2[%c0, %c0_0] : memref<2x256xf32, #tpu.memory_space<vmem>>, vector<2x256xf32>
    %c0_1 = arith.constant 0 : index
    %c0_2 = arith.constant 0 : index
    %1 = vector.load %arg3[%c0_1, %c0_2] : memref<1x256xf32, #tpu.memory_space<vmem>>, vector<1x256xf32>
    %2 = vector.broadcast %1 : vector<1x256xf32> to vector<2x256xf32>
    %3 = arith.addf %0, %2 : vector<2x256xf32>
    %c0_3 = arith.constant 0 : index
    %c0_4 = arith.constant 0 : index
    %4 = vector.load %arg4[%c0_3, %c0_4] : memref<2x256xf32, #tpu.memory_space<vmem>>, vector<2x256xf32>
    tpu.vector_store %arg4[%c0_3, %c0_4], %3 {strides = array<i32>} : memref<2x256xf32, #tpu.memory_space<vmem>>, vector<2x256xf32>,
    return
  }
  func.func @transform_0(%arg0: i32, %arg1: i32) -> (i32, i32) {
    %c0_i32 = arith.constant 0 : i32
    return %arg1, %arg0 : i32, i32
  }
  func.func @transform_1(%arg0: i32, %arg1: i32) -> (i32, i32) {
    %c0_i32 = arith.constant 0 : i32
    %c0_i32_0 = arith.constant 0 : i32
    return %c0_i32, %arg0 : i32, i32
  }
  func.func @transform_2(%arg0: i32, %arg1: i32) -> (i32, i32) {
    %c0_i32 = arith.constant 0 : i32
    return %arg1, %arg0 : i32, i32
  }
}

</mosaic_0001>

<bundles_post_ra>
// kernel: tpu_custom_call.1
= control target key start
LH: loop header
LB: loop body
LE: loop exit
PB: predicated region body
PF: predicated region fallthrough
CT: control target
= control target key end

     0   :  { %7 = vsyncpa [#allocation3], 0  ;;  %s157_s0 = inlined_call_operand.hbm [shape: f32[2,256], index: 0, kind: input, shape index: {}]   ;;  %s158_s1 = inlined_call_operand.vmem [shape: f32[1,256], index: 1, kind: input, shape index: {}]   ;;  %s159_s2 = inlined_call_operand.hbm [shape: f32[2,256], index: 2, kind: output, shape index: {}]  }
   0x1   :  { %8 = vsyncpa [#allocation4], 0  ;;  %s112_s9 = smov [#allocation2]   ;;  %s64_s13 = scalar_lea.hbm %s157_s0, 64 }
   0x2   :  { %s15_s10 = sshll.u32 %s112_s9, 4  ;;  %p65_p0 = scmp.ne.s32.totalorder %s157_s0, %s64_s13  ;;  %s16_s10 = int_to_ptr.vmem [resolvable:$true] %s15_s10 }
   0x3   :  { %p68_p1 = scmp.lt.u32.totalorder %s64_s13, %s157_s0 }
   0x5   :  { %p70_p2 = pnand %p68_p1, %p65_p0 }
   0x7   :  { %73 = shalt.err (!%p70_p2)
}
   0x8   :  { %s74_s18 = scalar_lea.vmem %s16_s10, 64  ;;  %p79_p4 = scmp.lt.s32.totalorder %s16_s10, %s16_s10 }
   0x9   :  { %p75_p3 = scmp.ne.s32.totalorder %s16_s10, %s74_s18  ;;  %p80_p5 = scmp.lt.s32.totalorder %s74_s18, %s74_s18 }
   0xb   :  { %p81_p6 = por %p80_p5, %p79_p4 }
   0xd   :  { %p82_p7 = pnand %p81_p6, %p75_p3 }
   0xf   :  { %85 = shalt.err (!%p82_p7)
}
  0x10   :  { %18 = dma.hbm_to_vmem [thread:$0]  %s157_s0, 64, %s16_s10, [#allocation3]  }
  0x11   :  { %108 = dma.done.wait [#allocation3], 64  }
  0x12   :  { %109 = vsyncadd [#allocation3], 4294967232  ;;  %v27_v0 = vlaneseq  ;;  %v113_v1 = vmov 1983009808   ;;  %v25_v7 = vld [vmem:[%s158_s1] sm:$0x3] }
  0x13   :  { %v37_v2 = vunpack.c.l.s4 %v113_v1  ;;  %v24_v12 = vld [vmem:[#allocation2] sm:$0xf]  ;;  %s114_s23 = smov [#allocation5]  }
  0x14   :  { %v28_v3 = vshrl.u32 %v27_v0, 7  ;;  %s52_s0 = sshll.u32 %s114_s23, 4  ;;  %s53_s0 = int_to_ptr.vmem [resolvable:$true] %s52_s0 }
  0x15   :  { %v38_v6 = vunpack.c.0.s8 %v37_v2  ;;  %s86_s24 = scalar_lea.vmem %s53_s0, 64  ;;  %p91_p9 = scmp.lt.s32.totalorder %s53_s0, %s53_s0 }
  0x16   :  { %v29_v4 = vsub.s32 0, %v28_v3  ;;  %v33_v5 = vsub.s32 1, %v28_v3  ;;  %p87_p8 = scmp.ne.s32.totalorder %s53_s0, %s86_s24  ;;  %p92_p10 = scmp.lt.s32.totalorder %s86_s24, %s86_s24 }
  0x17   :  { %v41_v10 = vsub.s32 %v38_v6, %v28_v3 }
  0x18   :  { %v30_v8 = vrot.slane %v25_v7, %v29_v4  ;;  %v34_v9 = vrot.slane %v25_v7, %v33_v5  ;;  %p93_p11 = por %p92_p10, %p91_p9 }
  0x1a   :  { %v35_v11 = vcombine.low %v30_v8, %v34_v9  ;;  %p94_p12 = pnand %p93_p11, %p87_p8 }
  0x1c   :  { %v42_v13 = vrot.slane %v35_v11, %v41_v10 }
  0x1e   :  { %v44_v14 = vadd.f32 %v42_v13, %v24_v12 }
  0x20   :  { %45 = vst [vmem:[#allocation5] sm:$0xf] %v44_v14 }
  0x21   :  { %97 = shalt.err (!%p94_p12)
}
  0x22   :  { %s98_s26 = scalar_lea.hbm %s159_s2, 64 }
  0x23   :  { %p99_p13 = scmp.ne.s32.totalorder %s159_s2, %s98_s26  ;;  %p102_p0 = scmp.lt.u32.totalorder %s98_s26, %s159_s2 }
  0x25   :  { %p104_p1 = pnand %p102_p0, %p99_p13 }
  0x27   :  { %107 = shalt.err (!%p104_p1)
}
  0x28   :  { %55 = dma.vmem_to_hbm [thread:$0]  %s53_s0, 64, %s159_s2, [#allocation4]  }
  0x29   :  { %110 = dma.done.wait [#allocation4], 64  }
  0x2a   :  { %111 = vsyncadd [#allocation4], 4294967232 }
  0x2b   :  { %59 = vsyncpa [#allocation3], 1 }
  0x2c   :  { %60 = vsyncpa [#allocation4], 1 }

</bundles_post_ra>
